<compile_context>
chip_gen: v7x
topology: tpu7x:2x2x1
jax: 0.10.0
libtpu: 0.0.40
codegen_flags: <defaults>
</compile_context>

<pallas_src>
import functools
import math

import jax
import jax.numpy as jnp
from jax.experimental import pallas as pl
from jax.experimental.pallas import tpu as pltpu


# ---------------------------------------------------------------------------
# Fused MHA-block kernel (QKV proj -> attention -> merge heads -> output proj)
# ---------------------------------------------------------------------------

def _mha_block_kernel(*refs, heads, scale, self_attention, emit_scores):
    # Parse refs according to the statically-known configuration.
    idx = 0
    q_ref = refs[idx]; idx += 1
    if self_attention:
        k_ref = q_ref
        v_ref = q_ref
    else:
        k_ref = refs[idx]; idx += 1
        v_ref = refs[idx]; idx += 1
    mask_ref = refs[idx]; idx += 1
    wqkv_ref = refs[idx]; idx += 1
    bqkv_ref = refs[idx]; idx += 1
    wo_ref = refs[idx]; idx += 1
    bo_ref = refs[idx]; idx += 1
    o_ref = refs[idx]; idx += 1
    s_ref = refs[idx] if emit_scores else None

    f32 = jnp.float32
    bf16 = jnp.bfloat16
    D = wo_ref.shape[0]
    Dh = D // heads

    w_qkv = wqkv_ref[...].astype(bf16)            # [D, 3D]  (MXU operand)
    b_qkv = bqkv_ref[...].astype(f32)             # [1, 3D]

    if self_attention:
        # Fused QKV projection: one read of x, one [S,D]x[D,3D] matmul.
        x = q_ref[0].astype(bf16)                                     # [S, D]
        qkv = jnp.dot(x, w_qkv, preferred_element_type=f32) + b_qkv   # [S, 3D]
        q_p = qkv[:, :D]
        k_p = qkv[:, D:2 * D]
        v_p = qkv[:, 2 * D:]
    else:
        q_p = jnp.dot(q_ref[0].astype(bf16), w_qkv[:, :D],
                      preferred_element_type=f32) + b_qkv[:, :D]
        k_p = jnp.dot(k_ref[0].astype(bf16), w_qkv[:, D:2 * D],
                      preferred_element_type=f32) + b_qkv[:, D:2 * D]
        v_p = jnp.dot(v_ref[0].astype(bf16), w_qkv[:, 2 * D:],
                      preferred_element_type=f32) + b_qkv[:, 2 * D:]

    # Fold 1/sqrt(d_k) into Q (S*D elements) instead of scaling S*S scores.
    q_p = q_p * scale
    add_mask = mask_ref[0].astype(f32)            # [S, S]: 0 keep / -1e9 masked

    ctx_parts = []
    for h in range(heads):                        # static unroll; no in-kernel transposes
        lo = h * Dh
        qh = q_p[:, lo:lo + Dh].astype(bf16)      # [S, Dh]
        kh = k_p[:, lo:lo + Dh].astype(bf16)      # [S, Dh]
        vh = v_p[:, lo:lo + Dh].astype(bf16)      # [S, Dh]

        scores = jnp.einsum("qd,kd->qk", qh, kh,
                            preferred_element_type=f32)               # [S, S] f32
        if emit_scores:
            # Matches `attention_scores_without_softmax` (pre-mask, pre-softmax).
            s_ref[0, h, :, :] = scores.astype(s_ref.dtype)

        scores = scores + add_mask
        mx = jnp.max(scores, axis=-1, keepdims=True)
        e = jnp.exp(scores - mx)
        denom = jnp.sum(e, axis=-1, keepdims=True)
        probs = e * pl.reciprocal(denom, approx=True)                 # EUP reciprocal

        ctx_parts.append(jnp.dot(probs.astype(bf16), vh,
                                 preferred_element_type=f32))         # [S, Dh]

    ctx = jnp.concatenate(ctx_parts, axis=-1)     # [S, D] == concat_heads
    out = jnp.dot(ctx.astype(bf16), wo_ref[...].astype(bf16),
                  preferred_element_type=f32) + bo_ref[...].astype(f32)
    o_ref[0] = out.astype(o_ref.dtype)


def multi_head_attention_block(q, k, v, mask, params, heads, *, return_scores=False):
    """q, k, v: [B, S, D] f32; mask: None or broadcastable to [B, S, S] (0 = masked).

    Returns w_0(attention(q, k, v)) of shape [B, S, D]; with return_scores=True also
    returns the pre-softmax attention scores [B, heads, S, S] (the module's
    `self.attention_scores` attribute). Dropout is eval-mode identity.
    """
    B, S, D = q.shape
    assert k.shape == (B, S, D) and v.shape == (B, S, D)
    assert D % heads == 0, "d_model not divisible by h"
    Dh = D // heads
    scale = 1.0 / math.sqrt(Dh)
    self_attention = (q is k) and (k is v)

    # Fused QKV weight/bias: [D, 3D], [1, 3D].
    wqkv = jnp.concatenate([params["wq"], params["wk"], params["wv"]], axis=1)
    bqkv = jnp.concatenate([params["bq"], params["bk"], params["bv"]]).reshape(1, 3 * D)
    bo = params["bo"].reshape(1, D)

    if mask is None:
        add_mask = jnp.zeros((B, S, S), jnp.float32)
    else:
        add_mask = jnp.where(jnp.broadcast_to(mask, (B, S, S)) == 0,
                             jnp.float32(-1e9), jnp.float32(0.0))

    act_spec = pl.BlockSpec((1, S, D), lambda b: (b, 0, 0))
    operands = [q]
    in_specs = [act_spec]
    if not self_attention:
        operands += [k, v]
        in_specs += [act_spec, act_spec]
    operands += [add_mask, wqkv, bqkv, params["wo"], bo]
    in_specs += [
        pl.BlockSpec((1, S, S), lambda b: (b, 0, 0)),      # additive mask
        pl.BlockSpec((D, 3 * D), lambda b: (0, 0)),        # fused W_qkv
        pl.BlockSpec((1, 3 * D), lambda b: (0, 0)),        # fused b_qkv
        pl.BlockSpec((D, D), lambda b: (0, 0)),            # W_o
        pl.BlockSpec((1, D), lambda b: (0, 0)),            # b_o
    ]

    out_shape = [jax.ShapeDtypeStruct((B, S, D), q.dtype)]
    out_specs = [pl.BlockSpec((1, S, D), lambda b: (b, 0, 0))]
    if return_scores:
        out_shape.append(jax.ShapeDtypeStruct((B, heads, S, S), jnp.float32))
        out_specs.append(pl.BlockSpec((1, heads, S, S), lambda b: (b, 0, 0, 0)))

    flops = 2 * B * (4 * S * D * D + 2 * heads * S * S * Dh)
    bytes_accessed = 4 * (4 * B * S * D + B * S * S + 4 * D * D + 4 * D
                          + (B * heads * S * S if return_scores else 0))
    cost = pl.CostEstimate(flops=flops, transcendentals=B * heads * S * S,
                           bytes_accessed=bytes_accessed)

    kernel = functools.partial(_mha_block_kernel, heads=heads, scale=scale,
                               self_attention=self_attention,
                               emit_scores=return_scores)

    result = pl.pallas_call(
        kernel,
        out_shape=tuple(out_shape),
        grid=(B,),
        in_specs=in_specs,
        out_specs=tuple(out_specs),
        compiler_params=pltpu.CompilerParams(dimension_semantics=("parallel",)),
        cost_estimate=cost,
    )(*operands)

    if return_scores:
        return result
    return result[0]


# ---------------------------------------------------------------------------
# Parameter init and pure-JAX reference (for self-check)
# ---------------------------------------------------------------------------

def init_params(key, d_model, dtype=jnp.float32):
    ks = jax.random.split(key, 8)

    def lin(kw, kb):
        w = jax.random.normal(kw, (d_model, d_model), dtype) / math.sqrt(d_model)
        b = 0.1 * jax.random.normal(kb, (d_model,), dtype)
        return w, b

    wq, bq = lin(ks[0], ks[1])
    wk, bk = lin(ks[2], ks[3])
    wv, bv = lin(ks[4], ks[5])
    wo, bo = lin(ks[6], ks[7])
    return dict(wq=wq, bq=bq, wk=wk, bk=bk, wv=wv, bv=bv, wo=wo, bo=bo)


def reference_forward(q, k, v, mask, params, heads):
    B, S, D = q.shape
    Dh = D // heads

    def split_heads(x):
        return x.reshape(B, S, heads, Dh).transpose(0, 2, 1, 3)

    Q = split_heads(q @ params["wq"] + params["bq"])
    K = split_heads(k @ params["wk"] + params["bk"])
    V = split_heads(v @ params["wv"] + params["bv"])
    scores = jnp.einsum("bhqd,bhkd->bhqk", Q, K) / math.sqrt(Dh)
    if mask is not None:
        m = jnp.broadcast_to(mask, (B, S, S))[:, None, :, :]
        scores = jnp.where(m == 0, -1e9, scores)
    probs = jax.nn.softmax(scores, axis=-1)
    ctx = jnp.einsum("bhqk,bhkd->bhqd", probs, V)
    ctx = ctx.transpose(0, 2, 1, 3).reshape(B, S, D)
    return ctx @ params["wo"] + params["bo"]


# ---------------------------------------------------------------------------
# main
# ---------------------------------------------------------------------------

if __name__ == "__main__":
    B, S, D, H = 2, 8, 32, 4   # batch, seq, d_model, heads
    # TODO(synk): nn.Dropout is treated as eval-mode identity (p unused at eval).

    key = jax.random.PRNGKey(0)
    kq, kk, kv, kp = jax.random.split(key, 4)
    x = jax.random.normal(kq, (B, S, D), jnp.float32)
    k_in = jax.random.normal(kk, (B, S, D), jnp.float32)
    v_in = jax.random.normal(kv, (B, S, D), jnp.float32)
    params = init_params(kp, D)

    # PyTorch-style mask: nonzero = attend, 0 = masked (pad last 2 keys of batch 1).
    mask = jnp.ones((B, S, S), jnp.float32).at[1, :, S - 2:].set(0.0)

    # 1) Self-attention (q is k is v) -> fused single-matmul QKV path.
    out_self = multi_head_attention_block(x, x, x, mask, params, H)
    jax.block_until_ready(out_self)
    assert out_self.shape == (B, S, D)
    ref_self = reference_forward(x, x, x, mask, params, H)
    err_self = float(jnp.max(jnp.abs(out_self - ref_self)))
    assert err_self < 1e-1, f"self-attention mismatch: {err_self}"

    # 2) Cross-attention (distinct k/v) -> general projection path.
    out_cross = multi_head_attention_block(x, k_in, v_in, mask, params, H)
    jax.block_until_ready(out_cross)
    ref_cross = reference_forward(x, k_in, v_in, mask, params, H)
    err_cross = float(jnp.max(jnp.abs(out_cross - ref_cross)))
    assert err_cross < 1e-1, f"cross-attention mismatch: {err_cross}"

    # 3) Optional pre-softmax scores (== the module's self.attention_scores).
    out_s, scores = multi_head_attention_block(x, x, x, mask, params, H,
                                               return_scores=True)
    jax.block_until_ready(scores)
    assert scores.shape == (B, H, S, S)
    assert out_s.shape == (B, S, D)

    print("KERNEL_OK")
</pallas_src>

<mosaic_0001>
module attributes {stable_mosaic.version = 11 : i64} {
  func.func @_mha_block_kernel(%arg0: i32, %arg1: memref<1x8x32xf32, #tpu.memory_space<vmem>>, %arg2: memref<1x8x8xf32, #tpu.memory_space<vmem>>, %arg3: memref<32x96xf32, #tpu.memory_space<vmem>>, %arg4: memref<1x96xf32, #tpu.memory_space<vmem>>, %arg5: memref<32x32xf32, #tpu.memory_space<vmem>>, %arg6: memref<1x32xf32, #tpu.memory_space<vmem>>, %arg7: memref<1x8x32xf32, #tpu.memory_space<vmem>>) attributes {dimension_semantics = [#tpu.dimension_semantics<parallel>], iteration_bounds = array<i64: 2>, scalar_prefetch = 0 : i64, scratch_operands = 0 : i64, tpu.core_type = #tpu.core_type<tc>, window_params = [{transform_indices = @transform_0, window_bounds = array<i64: 1, 8, 32>}, {transform_indices = @transform_1, window_bounds = array<i64: 1, 8, 8>}, {pipeline_mode = #tpu.pipeline_mode<synchronous>, transform_indices = @transform_2, window_bounds = array<i64: 32, 96>}, {pipeline_mode = #tpu.pipeline_mode<synchronous>, transform_indices = @transform_3, window_bounds = array<i64: 1, 96>}, {pipeline_mode = #tpu.pipeline_mode<synchronous>, transform_indices = @transform_4, window_bounds = array<i64: 32, 32>}, {pipeline_mode = #tpu.pipeline_mode<synchronous>, transform_indices = @transform_5, window_bounds = array<i64: 1, 32>}, {transform_indices = @transform_6, window_bounds = array<i64: 1, 8, 32>}]} {
    %c0 = arith.constant 0 : index
    %c0_0 = arith.constant 0 : index
    %0 = vector.load %arg3[%c0, %c0_0] : memref<32x96xf32, #tpu.memory_space<vmem>>, vector<32x96xf32>
    %1 = arith.truncf %0 : vector<32x96xf32> to vector<32x96xbf16>
    %c0_1 = arith.constant 0 : index
    %c0_2 = arith.constant 0 : index
    %2 = vector.load %arg4[%c0_1, %c0_2] : memref<1x96xf32, #tpu.memory_space<vmem>>, vector<1x96xf32>
    %c0_3 = arith.constant 0 : index
    %c0_4 = arith.constant 0 : index
    %c0_5 = arith.constant 0 : index
    %3 = vector.load %arg1[%c0_3, %c0_4, %c0_5] : memref<1x8x32xf32, #tpu.memory_space<vmem>>, vector<1x8x32xf32>
    %4 = vector.shape_cast %3 : vector<1x8x32xf32> to vector<8x32xf32>
    %5 = arith.truncf %4 : vector<8x32xf32> to vector<8x32xbf16>
    %cst = arith.constant dense<0.000000e+00> : vector<8x96xf32>
    %6 = tpu.matmul %5, %1, %cst {dimension_numbers = #tpu.dot_dimension_numbers<[1], [0], [0], [1], [0, 0, 1, 1], [], []>} : vector<8x32xbf16>, vector<32x96xbf16>, vector<8x96xf32> -> vector<8x96xf32>
    %7 = vector.broadcast %2 : vector<1x96xf32> to vector<8x96xf32>
    %8 = arith.addf %6, %7 : vector<8x96xf32>
    %9 = vector.extract_strided_slice %8 {offsets = [0, 0], sizes = [8, 32], strides = [1, 1]} : vector<8x96xf32> to vector<8x32xf32>
    %10 = vector.extract_strided_slice %8 {offsets = [0, 32], sizes = [8, 32], strides = [1, 1]} : vector<8x96xf32> to vector<8x32xf32>
    %11 = vector.extract_strided_slice %8 {offsets = [0, 64], sizes = [8, 32], strides = [1, 1]} : vector<8x96xf32> to vector<8x32xf32>
    %cst_6 = arith.constant 0.353553385 : f32
    %12 = vector.broadcast %cst_6 : f32 to vector<8x32xf32>
    %13 = arith.mulf %9, %12 : vector<8x32xf32>
    %c0_7 = arith.constant 0 : index
    %c0_8 = arith.constant 0 : index
    %c0_9 = arith.constant 0 : index
    %14 = vector.load %arg2[%c0_7, %c0_8, %c0_9] : memref<1x8x8xf32, #tpu.memory_space<vmem>>, vector<1x8x8xf32>
    %15 = vector.shape_cast %14 : vector<1x8x8xf32> to vector<8x8xf32>
    %16 = vector.extract_strided_slice %13 {offsets = [0, 0], sizes = [8, 8], strides = [1, 1]} : vector<8x32xf32> to vector<8x8xf32>
    %17 = arith.truncf %16 : vector<8x8xf32> to vector<8x8xbf16>
    %18 = vector.extract_strided_slice %10 {offsets = [0, 0], sizes = [8, 8], strides = [1, 1]} : vector<8x32xf32> to vector<8x8xf32>
    %19 = arith.truncf %18 : vector<8x8xf32> to vector<8x8xbf16>
    %20 = vector.extract_strided_slice %11 {offsets = [0, 0], sizes = [8, 8], strides = [1, 1]} : vector<8x32xf32> to vector<8x8xf32>
    %21 = arith.truncf %20 : vector<8x8xf32> to vector<8x8xbf16>
    "tpu.trace_start"() <{level = 10 : i32, message = "qd,kd->qk"}> : () -> ()
    %cst_10 = arith.constant dense<0.000000e+00> : vector<8x8xf32>
    %22 = tpu.matmul %17, %19, %cst_10 {dimension_numbers = #tpu.dot_dimension_numbers<[1], [1], [0], [0], [0, 0, 1, 0], [], []>} : vector<8x8xbf16>, vector<8x8xbf16>, vector<8x8xf32> -> vector<8x8xf32>
    "tpu.trace_stop"() : () -> ()
    %23 = arith.addf %22, %15 : vector<8x8xf32>
    %cst_11 = arith.constant dense<0xFF800000> : vector<8xf32>
    %24 = vector.multi_reduction <maximumf>, %23, %cst_11 [1] : vector<8x8xf32> to vector<8xf32>
    %25 = vector.shape_cast %24 : vector<8xf32> to vector<8x1xf32>
    %26 = vector.broadcast %25 : vector<8x1xf32> to vector<8x8xf32>
    %27 = arith.subf %23, %26 : vector<8x8xf32>
    %28 = math.exp %27 : vector<8x8xf32>
    %cst_12 = arith.constant dense<0.000000e+00> : vector<8xf32>
    %29 = vector.multi_reduction <add>, %28, %cst_12 [1] : vector<8x8xf32> to vector<8xf32>
    %30 = vector.shape_cast %29 : vector<8xf32> to vector<8x1xf32>
    %31 = tpu.reciprocal %30 {approx = true} : vector<8x1xf32> -> vector<8x1xf32>
    %32 = vector.broadcast %31 : vector<8x1xf32> to vector<8x8xf32>
    %33 = arith.mulf %28, %32 : vector<8x8xf32>
    %34 = arith.truncf %33 : vector<8x8xf32> to vector<8x8xbf16>
    %cst_13 = arith.constant dense<0.000000e+00> : vector<8x8xf32>
    %35 = tpu.matmul %34, %21, %cst_13 {dimension_numbers = #tpu.dot_dimension_numbers<[1], [0], [0], [1], [0, 0, 1, 1], [], []>} : vector<8x8xbf16>, vector<8x8xbf16>, vector<8x8xf32> -> vector<8x8xf32>
    %36 = vector.extract_strided_slice %13 {offsets = [0, 8], sizes = [8, 8], strides = [1, 1]} : vector<8x32xf32> to vector<8x8xf32>
    %37 = arith.truncf %36 : vector<8x8xf32> to vector<8x8xbf16>
    %38 = vector.extract_strided_slice %10 {offsets = [0, 8], sizes = [8, 8], strides = [1, 1]} : vector<8x32xf32> to vector<8x8xf32>
    %39 = arith.truncf %38 : vector<8x8xf32> to vector<8x8xbf16>
    %40 = vector.extract_strided_slice %11 {offsets = [0, 8], sizes = [8, 8], strides = [1, 1]} : vector<8x32xf32> to vector<8x8xf32>
    %41 = arith.truncf %40 : vector<8x8xf32> to vector<8x8xbf16>
    "tpu.trace_start"() <{level = 10 : i32, message = "qd,kd->qk"}> : () -> ()
    %cst_14 = arith.constant dense<0.000000e+00> : vector<8x8xf32>
    %42 = tpu.matmul %37, %39, %cst_14 {dimension_numbers = #tpu.dot_dimension_numbers<[1], [1], [0], [0], [0, 0, 1, 0], [], []>} : vector<8x8xbf16>, vector<8x8xbf16>, vector<8x8xf32> -> vector<8x8xf32>
    "tpu.trace_stop"() : () -> ()
    %43 = arith.addf %42, %15 : vector<8x8xf32>
    %cst_15 = arith.constant dense<0xFF800000> : vector<8xf32>
    %44 = vector.multi_reduction <maximumf>, %43, %cst_15 [1] : vector<8x8xf32> to vector<8xf32>
    %45 = vector.shape_cast %44 : vector<8xf32> to vector<8x1xf32>
    %46 = vector.broadcast %45 : vector<8x1xf32> to vector<8x8xf32>
    %47 = arith.subf %43, %46 : vector<8x8xf32>
    %48 = math.exp %47 : vector<8x8xf32>
    %cst_16 = arith.constant dense<0.000000e+00> : vector<8xf32>
    %49 = vector.multi_reduction <add>, %48, %cst_16 [1] : vector<8x8xf32> to vector<8xf32>
    %50 = vector.shape_cast %49 : vector<8xf32> to vector<8x1xf32>
    %51 = tpu.reciprocal %50 {approx = true} : vector<8x1xf32> -> vector<8x1xf32>
    %52 = vector.broadcast %51 : vector<8x1xf32> to vector<8x8xf32>
    %53 = arith.mulf %48, %52 : vector<8x8xf32>
    %54 = arith.truncf %53 : vector<8x8xf32> to vector<8x8xbf16>
    %cst_17 = arith.constant dense<0.000000e+00> : vector<8x8xf32>
    %55 = tpu.matmul %54, %41, %cst_17 {dimension_numbers = #tpu.dot_dimension_numbers<[1], [0], [0], [1], [0, 0, 1, 1], [], []>} : vector<8x8xbf16>, vector<8x8xbf16>, vector<8x8xf32> -> vector<8x8xf32>
    %56 = vector.extract_strided_slice %13 {offsets = [0, 16], sizes = [8, 8], strides = [1, 1]} : vector<8x32xf32> to vector<8x8xf32>
    %57 = arith.truncf %56 : vector<8x8xf32> to vector<8x8xbf16>
    %58 = vector.extract_strided_slice %10 {offsets = [0, 16], sizes = [8, 8], strides = [1, 1]} : vector<8x32xf32> to vector<8x8xf32>
    %59 = arith.truncf %58 : vector<8x8xf32> to vector<8x8xbf16>
    %60 = vector.extract_strided_slice %11 {offsets = [0, 16], sizes = [8, 8], strides = [1, 1]} : vector<8x32xf32> to vector<8x8xf32>
    %61 = arith.truncf %60 : vector<8x8xf32> to vector<8x8xbf16>
    "tpu.trace_start"() <{level = 10 : i32, message = "qd,kd->qk"}> : () -> ()
    %cst_18 = arith.constant dense<0.000000e+00> : vector<8x8xf32>
    %62 = tpu.matmul %57, %59, %cst_18 {dimension_numbers = #tpu.dot_dimension_numbers<[1], [1], [0], [0], [0, 0, 1, 0], [], []>} : vector<8x8xbf16>, vector<8x8xbf16>, vector<8x8xf32> -> vector<8x8xf32>
    "tpu.trace_stop"() : () -> ()
    %63 = arith.addf %62, %15 : vector<8x8xf32>
    %cst_19 = arith.constant dense<0xFF800000> : vector<8xf32>
    %64 = vector.multi_reduction <maximumf>, %63, %cst_19 [1] : vector<8x8xf32> to vector<8xf32>
    %65 = vector.shape_cast %64 : vector<8xf32> to vector<8x1xf32>
    %66 = vector.broadcast %65 : vector<8x1xf32> to vector<8x8xf32>
    %67 = arith.subf %63, %66 : vector<8x8xf32>
    %68 = math.exp %67 : vector<8x8xf32>
    %cst_20 = arith.constant dense<0.000000e+00> : vector<8xf32>
    %69 = vector.multi_reduction <add>, %68, %cst_20 [1] : vector<8x8xf32> to vector<8xf32>
    %70 = vector.shape_cast %69 : vector<8xf32> to vector<8x1xf32>
    %71 = tpu.reciprocal %70 {approx = true} : vector<8x1xf32> -> vector<8x1xf32>
    %72 = vector.broadcast %71 : vector<8x1xf32> to vector<8x8xf32>
    %73 = arith.mulf %68, %72 : vector<8x8xf32>
    %74 = arith.truncf %73 : vector<8x8xf32> to vector<8x8xbf16>
    %cst_21 = arith.constant dense<0.000000e+00> : vector<8x8xf32>
    %75 = tpu.matmul %74, %61, %cst_21 {dimension_numbers = #tpu.dot_dimension_numbers<[1], [0], [0], [1], [0, 0, 1, 1], [], []>} : vector<8x8xbf16>, vector<8x8xbf16>, vector<8x8xf32> -> vector<8x8xf32>
    %76 = vector.extract_strided_slice %13 {offsets = [0, 24], sizes = [8, 8], strides = [1, 1]} : vector<8x32xf32> to vector<8x8xf32>
    %77 = arith.truncf %76 : vector<8x8xf32> to vector<8x8xbf16>
    %78 = vector.extract_strided_slice %10 {offsets = [0, 24], sizes = [8, 8], strides = [1, 1]} : vector<8x32xf32> to vector<8x8xf32>
    %79 = arith.truncf %78 : vector<8x8xf32> to vector<8x8xbf16>
    %80 = vector.extract_strided_slice %11 {offsets = [0, 24], sizes = [8, 8], strides = [1, 1]} : vector<8x32xf32> to vector<8x8xf32>
    %81 = arith.truncf %80 : vector<8x8xf32> to vector<8x8xbf16>
    "tpu.trace_start"() <{level = 10 : i32, message = "qd,kd->qk"}> : () -> ()
    %cst_22 = arith.constant dense<0.000000e+00> : vector<8x8xf32>
    %82 = tpu.matmul %77, %79, %cst_22 {dimension_numbers = #tpu.dot_dimension_numbers<[1], [1], [0], [0], [0, 0, 1, 0], [], []>} : vector<8x8xbf16>, vector<8x8xbf16>, vector<8x8xf32> -> vector<8x8xf32>
    "tpu.trace_stop"() : () -> ()
    %83 = arith.addf %82, %15 : vector<8x8xf32>
    %cst_23 = arith.constant dense<0xFF800000> : vector<8xf32>
    %84 = vector.multi_reduction <maximumf>, %83, %cst_23 [1] : vector<8x8xf32> to vector<8xf32>
    %85 = vector.shape_cast %84 : vector<8xf32> to vector<8x1xf32>
    %86 = vector.broadcast %85 : vector<8x1xf32> to vector<8x8xf32>
    %87 = arith.subf %83, %86 : vector<8x8xf32>
    %88 = math.exp %87 : vector<8x8xf32>
    %cst_24 = arith.constant dense<0.000000e+00> : vector<8xf32>
    %89 = vector.multi_reduction <add>, %88, %cst_24 [1] : vector<8x8xf32> to vector<8xf32>
    %90 = vector.shape_cast %89 : vector<8xf32> to vector<8x1xf32>
    %91 = tpu.reciprocal %90 {approx = true} : vector<8x1xf32> -> vector<8x1xf32>
    %92 = vector.broadcast %91 : vector<8x1xf32> to vector<8x8xf32>
    %93 = arith.mulf %88, %92 : vector<8x8xf32>
    %94 = arith.truncf %93 : vector<8x8xf32> to vector<8x8xbf16>
    %cst_25 = arith.constant dense<0.000000e+00> : vector<8x8xf32>
    %95 = tpu.matmul %94, %81, %cst_25 {dimension_numbers = #tpu.dot_dimension_numbers<[1], [0], [0], [1], [0, 0, 1, 1], [], []>} : vector<8x8xbf16>, vector<8x8xbf16>, vector<8x8xf32> -> vector<8x8xf32>
    %96 = tpu.concatenate %35, %55, %75, %95 in 1 : vector<8x8xf32>, vector<8x8xf32>, vector<8x8xf32>, vector<8x8xf32> -> vector<8x32xf32>
    %97 = arith.truncf %96 : vector<8x32xf32> to vector<8x32xbf16>
    %c0_26 = arith.constant 0 : index
    %c0_27 = arith.constant 0 : index
    %98 = vector.load %arg5[%c0_26, %c0_27] : memref<32x32xf32, #tpu.memory_space<vmem>>, vector<32x32xf32>
    %99 = arith.truncf %98 : vector<32x32xf32> to vector<32x32xbf16>
    %cst_28 = arith.constant dense<0.000000e+00> : vector<8x32xf32>
    %100 = tpu.matmul %97, %99, %cst_28 {dimension_numbers = #tpu.dot_dimension_numbers<[1], [0], [0], [1], [0, 0, 1, 1], [], []>} : vector<8x32xbf16>, vector<32x32xbf16>, vector<8x32xf32> -> vector<8x32xf32>
    %c0_29 = arith.constant 0 : index
    %c0_30 = arith.constant 0 : index
    %101 = vector.load %arg6[%c0_29, %c0_30] : memref<1x32xf32, #tpu.memory_space<vmem>>, vector<1x32xf32>
    %102 = vector.broadcast %101 : vector<1x32xf32> to vector<8x32xf32>
    %103 = arith.addf %100, %102 : vector<8x32xf32>
    %c0_31 = arith.constant 0 : index
    %c0_32 = arith.constant 0 : index
    %c0_33 = arith.constant 0 : index
    %104 = vector.load %arg7[%c0_31, %c0_32, %c0_33] : memref<1x8x32xf32, #tpu.memory_space<vmem>>, vector<1x8x32xf32>
    %105 = vector.shape_cast %104 : vector<1x8x32xf32> to vector<8x32xf32>
    %106 = vector.shape_cast %103 : vector<8x32xf32> to vector<1x8x32xf32>
    tpu.vector_store %arg7[%c0_31, %c0_32, %c0_33], %106 {strides = array<i32>} : memref<1x8x32xf32, #tpu.memory_space<vmem>>, vector<1x8x32xf32>,
    return
  }
  func.func @transform_0(%arg0: i32) -> (i32, i32, i32) {
    %c0_i32 = arith.constant 0 : i32
    %c0_i32_0 = arith.constant 0 : i32
    %c0_i32_1 = arith.constant 0 : i32
    return %arg0, %c0_i32, %c0_i32_0 : i32, i32, i32
  }
  func.func @transform_1(%arg0: i32) -> (i32, i32, i32) {
    %c0_i32 = arith.constant 0 : i32
    %c0_i32_0 = arith.constant 0 : i32
    %c0_i32_1 = arith.constant 0 : i32
    return %arg0, %c0_i32, %c0_i32_0 : i32, i32, i32
  }
  func.func @transform_2(%arg0: i32) -> (i32, i32) {
    %c0_i32 = arith.constant 0 : i32
    %c0_i32_0 = arith.constant 0 : i32
    %c0_i32_1 = arith.constant 0 : i32
    return %c0_i32, %c0_i32_0 : i32, i32
  }
  func.func @transform_3(%arg0: i32) -> (i32, i32) {
    %c0_i32 = arith.constant 0 : i32
    %c0_i32_0 = arith.constant 0 : i32
    %c0_i32_1 = arith.constant 0 : i32
    return %c0_i32, %c0_i32_0 : i32, i32
  }
  func.func @transform_4(%arg0: i32) -> (i32, i32) {
    %c0_i32 = arith.constant 0 : i32
    %c0_i32_0 = arith.constant 0 : i32
    %c0_i32_1 = arith.constant 0 : i32
    return %c0_i32, %c0_i32_0 : i32, i32
  }
  func.func @transform_5(%arg0: i32) -> (i32, i32) {
    %c0_i32 = arith.constant 0 : i32
    %c0_i32_0 = arith.constant 0 : i32
    %c0_i32_1 = arith.constant 0 : i32
    return %c0_i32, %c0_i32_0 : i32, i32
  }
  func.func @transform_6(%arg0: i32) -> (i32, i32, i32) {
    %c0_i32 = arith.constant 0 : i32
    %c0_i32_0 = arith.constant 0 : i32
    %c0_i32_1 = arith.constant 0 : i32
    return %arg0, %c0_i32, %c0_i32_0 : i32, i32, i32
  }
}

</mosaic_0001>

<bundles_post_ra>
// kernel: tpu_custom_call.1
= control target key start
LH: loop header
LB: loop body
LE: loop exit
PB: predicated region body
PF: predicated region fallthrough
CT: control target
= control target key end

     0   :  { %s1869_s0 = inlined_call_operand.hbm [shape: f32[2,8,32], index: 0, kind: input, shape index: {}]   ;;  %s1870_s1 = inlined_call_operand.hbm [shape: f32[2,8,8], index: 1, kind: input, shape index: {}]   ;;  %s1871_s2 = inlined_call_operand.hbm [shape: f32[32,96], index: 2, kind: input, shape index: {}]   ;;  %s1872_s3 = inlined_call_operand.vmem [shape: f32[1,96], index: 3, kind: input, shape index: {}]   ;;  %s1873_s4 = inlined_call_operand.hbm [shape: f32[32,32], index: 4, kind: input, shape index: {}]   ;;  %s1874_s5 = inlined_call_operand.vmem [shape: f32[1,32], index: 5, kind: input, shape index: {}]   ;;  %s1875_s6 = inlined_call_operand.hbm [shape: f32[2,8,32], index: 6, kind: output, shape index: {}]  }
   0x1   :  { %1880 = sst [smem:[#allocation17_spill]] %s1871_s2 }
   0x2   :  { %1881 = sst [smem:[#allocation18_spill]] %s1873_s4 }
   0x3   :  { %11 = vsyncpa [#allocation3], 0 }
   0x4   :  { %13 = vsyncpa [#allocation3 + $0x1], 0 }
   0x5   :  { %14 = vsyncpa [#allocation6], 0 }
   0x6   :  { %16 = vsyncpa [#allocation6 + $0x1], 0 }
   0x7   :  { %17 = vsyncpa [#allocation9], 0 }
   0x8   :  { %18 = vsyncpa [#allocation4], 0 }
   0x9   :  { %20 = vsyncpa [#allocation4 + $0x1], 0  ;;  %s1517_s21 = smov 0   ;;  %s1519_s22 = smov 0  }
   0xa   :  { %s1521_s23 = smov 0   ;;  %s1523_s24 = smov 0  }
   0xb LB: > { %s1538_s25 = sadd.s32 4294967295, %s1457_s24   ;;  %s1040_s26 = sadd.s32 4294967294, %s1457_s24   ;;  %s1457_s24 = sphi %s1523_s24, %s1905_s24   ;;  %s1453_s23 = sphi %s1521_s23, %s1904_s23   ;;  %s1449_s22 = sphi %s1519_s22, %s1903_s22   ;;  %s1445_s21 = sphi %s1517_s21, %s1902_s21  }
   0xc   : > { %p46_p0 = scmp.ne.s32.totalorder %s1449_s22, %s1445_s21  ;;  %p1876_p1 = scmp.eq.s32.totalorder %s1538_s25, 0 }
   0xd   : > { %p186_p3 = scmp.eq.s32.totalorder %s1040_s26, 1  ;;  %p1041_p5 = scmp.ge.s32.totalorder %s1457_s24, 1 }
   0xe   : > { %p1547_p4 = por %p1876_p1, %p46_p0  ;;  %p193_p7 = scmp.lt.s32.totalorder %s1457_s24, 3 }
   0xf   : > { %p1552_p6 = por %p186_p3, %p46_p0  ;;  %s1459_s30 = smov [#allocation7]  }
  0x10   : > { %s1882_s27 = scalar_select %p1547_p4, 1, 0 }
  0x11   : > { %s1883_s28 = scalar_select %p1552_p6, 1, 0 }
  0x12   : > { %p1557_p8 = pnand %p1041_p5, %p193_p7  ;;  %s205_s7 = sshll.u32 %s1459_s30, 4  ;;  %s1561_s7 = int_to_ptr.vmem [resolvable:$true] %s205_s7 }
  0x13   : > { %s1460_s9 = smov [#allocation8]   ;;  %s1886_s2 = sld [smem:[#allocation17_spill]] }
  0x14   : > { %s1884_s29 = scalar_select %p1557_p8, 1, 0 }
  0x15   : > { %p1171_p9 = pneg %p1557_p8  ;;  %s221_s10 = sshll.u32 %s1460_s9, 4  ;;  %s1572_s10 = int_to_ptr.vmem [resolvable:$true] %s221_s10 }
  0x17   : > { %p1568_p11 = pnand %p1171_p9, %p1876_p1 }
  0x19   : > { %s1263_s13 = scalar_lea.hbm %s1886_s2, 512  ;;  %p1265_p13 = pneg %p1568_p11 }
  0x1a   : > { %p1264_p12 = scmp.ne.s32.totalorder %s1886_s2, %s1263_s13  ;;  %p1270_p5 = scmp.lt.u32.totalorder %s1263_s13, %s1886_s2 }
  0x1c   : > { %p1266_p0 = pnand %p1265_p13, %p1264_p12 }
  0x1e   : > { %p1267_p3 = pneg %p1266_p0 }
  0x20   : > { %p1272_p7 = pnand %p1270_p5, %p1267_p3 }
  0x22   : > { %1275 = shalt.err (!%p1272_p7)
}
  0x23   : > { %s1276_s18 = scalar_lea.vmem %s1561_s7, 512  ;;  %p1284_p2 = scmp.lt.s32.totalorder %s1561_s7, %s1561_s7 }
  0x24   : > { %p1277_p9 = scmp.ne.s32.totalorder %s1561_s7, %s1276_s18  ;;  %p1285_p12 = scmp.lt.s32.totalorder %s1276_s18, %s1276_s18 }
  0x26   : > { %p1279_p10 = pnand %p1277_p9, %p1265_p13  ;;  %p1286_p0 = por %p1285_p12, %p1284_p2 }
  0x28   : > { %p1280_p1 = pneg %p1279_p10 }
  0x2a   : > { %p1287_p6 = pnand %p1286_p0, %p1280_p1 }
  0x2c   : > { %1290 = shalt.err (!%p1287_p6)
}
  0x2d   : > { %s1461_s19 = smov 128   ;;  %s1462_s20 = smov 8  }
  0x2e   : > { %1174 = dma.hbm_to_vmem [thread:$0]  (!%p1568_p11), %s1886_s2, 512, %s1561_s7, [#allocation6], %s1461_s19, %s1461_s19, %s1462_s20  }
  0x2f   : > { %s1887_s4 = sld [smem:[#allocation18_spill]] }
  0x35   : > { %s1291_s12 = scalar_lea.hbm %s1887_s4, 512 }
  0x36   : > { %p1292_p2 = scmp.ne.s32.totalorder %s1887_s4, %s1291_s12  ;;  %p1298_p10 = scmp.lt.u32.totalorder %s1291_s12, %s1887_s4 }
  0x38   : > { %p1294_p1 = pnand %p1292_p2, %p1265_p13 }
  0x3a   : > { %p1295_p6 = pneg %p1294_p1 }
  0x3c   : > { %p1300_p3 = pnand %p1298_p10, %p1295_p6 }
  0x3e   : > { %1303 = shalt.err (!%p1300_p3)
}
  0x3f   : > { %s1304_s7 = scalar_lea.vmem %s1572_s10, 512  ;;  %p1312_p12 = scmp.lt.s32.totalorder %s1572_s10, %s1572_s10 }
  0x40   : > { %p1305_p5 = scmp.ne.s32.totalorder %s1572_s10, %s1304_s7  ;;  %p1313_p0 = scmp.lt.s32.totalorder %s1304_s7, %s1304_s7 }
  0x42   : > { %p1307_p7 = pnand %p1305_p5, %p1265_p13  ;;  %p1314_p2 = por %p1313_p0, %p1312_p12 }
  0x44   : > { %p1308_p9 = pneg %p1307_p7 }
  0x46   : > { %p1315_p1 = pnand %p1314_p2, %p1308_p9 }
  0x48   : > { %1318 = shalt.err (!%p1315_p1)
}
  0x49   : > { %1177 = dma.hbm_to_vmem [thread:$0]  (!%p1568_p11), %s1887_s4, 512, %s1572_s10, [#allocation9], %s1461_s19, %s1461_s19, %s1462_s20  }
  0x4a   : > { %s1627_s26 = sadd.s32 1, %s1457_s24   ;;  %s33_s8 = sadd.s32 1, %s1453_s23 }
  0x4b   : > { %s30_s30 = ssub.s32 %s1457_s24, %s1627_s26  ;;  %p40_p13 = scmp.ne.s32.totalorder %s1453_s23, %s1449_s22 }
  0x4c   : > { %p31_p6 = scmp.eq.s32.totalorder %s30_s30, 0  ;;  %p41_p10 = scmp.eq.s32.totalorder %s1457_s24, 0 }
  0x4d   : > { %p1888_p3 = scmp.eq.s32.totalorder %s1538_s25, 1  ;;  %p1191_p7 = scmp.lt.s32.totalorder %s1457_s24, 2 }
  0x4e   : > { %s1643_s11 = scalar_select %p31_p6, %s1453_s23, %s33_s8  }
  0x4f   : > { %p1637_p5 = por %p1888_p3, %p40_p13  ;;  %p42_p9 = por %p41_p10, %p40_p13 }
  0x50   : > { %1890 = sst [smem:[#allocation16_spill]] %s1643_s11  ;;  %s238_s12 = sand.u32 1, %s1453_s23  }
  0x51   : > { %s1889_s9 = scalar_select %p1637_p5, 1, 0 }
  0x52   : > { %s1646_s10 = sshll.u32 %s238_s12, 3  ;;  %s1046_s19 = sshll.u32 %s1457_s24, 7 }
  0x53   : > { %s1652_s14 = scalar_lea.hbm %s1869_s0, %s1046_s19  ;;  %s242_s15 = scalar_lea.vmem [#allocation2], %s1646_s10 }
  0x54   : > { %s249_s16 = sshll.u32 %s242_s15, 4  ;;  %p1657_p11 = pnand %p1191_p7, %p42_p9  ;;  %s1655_s16 = int_to_ptr.vmem [resolvable:$true] %s249_s16 }
  0x55   : > { %s1664_s8 = scalar_lea.hbm %s1870_s1, %s1046_s19  ;;  %s256_s30 = sand.u32 1, %s1457_s24  }
  0x56   : > { %s239_s20 = scalar_lea.sflag [#allocation3], %s238_s12  ;;  %s1319_s13 = scalar_lea.hbm %s1652_s14, 128 }
  0x57   : > { %p1320_p12 = scmp.ne.s32.totalorder %s1652_s14, %s1319_s13  ;;  %p1321_p0 = pneg %p1657_p11 }
  0x58   : > { %s1324_s4 = scalar_lea.hbm %s1869_s0, 256  ;;  %p1325_p13 = scmp.lt.u32.totalorder %s1652_s14, %s1869_s0 }
  0x59   : > { %p1322_p2 = pnand %p1321_p0, %p1320_p12  ;;  %p1326_p6 = scmp.lt.u32.totalorder %s1324_s4, %s1319_s13 }
  0x5a   : > { %p1328_p3 = scmp.lt.u32.totalorder %s1319_s13, %s1652_s14 }
  0x5b   : > { %p1323_p1 = pneg %p1322_p2  ;;  %p1327_p10 = por %p1326_p6, %p1325_p13 }
  0x5d   : > { %p1329_p7 = por %p1328_p3, %p1327_p10 }
  0x5f   : > { %p1330_p9 = pnand %p1329_p7, %p1323_p1 }
  0x61   : > { %1333 = shalt.err (!%p1330_p9)
}
  0x62   : > { %s1334_s12 = scalar_lea.vmem %s1655_s16, 128  ;;  %s1463_s2 = smov [#allocation2]  }
  0x63   : > { %p1335_p12 = scmp.ne.s32.totalorder %s1655_s16, %s1334_s12  ;;  %s1339_s19 = sshll.u32 %s1463_s2, 4  ;;  %s1340_s19 = int_to_ptr.vmem [resolvable:$false] %s1339_s19 }
  0x64   : > { %s1341_s11 = scalar_lea.vmem %s1340_s19, 256  ;;  %p1342_p4 = scmp.lt.s32.totalorder %s1655_s16, %s1340_s19 }
  0x65   : > { %p1337_p2 = pnand %p1335_p12, %p1321_p0  ;;  %p1343_p13 = scmp.lt.s32.totalorder %s1341_s11, %s1334_s12 }
  0x67   : > { %p1338_p5 = pneg %p1337_p2  ;;  %p1344_p6 = por %p1343_p13, %p1342_p4 }
  0x69   : > { %p1345_p10 = pnand %p1344_p6, %p1338_p5 }
  0x6b   : > { %1348 = shalt.err (!%p1345_p10)
}
  0x6c   : > { %1181 = dma.hbm_to_vmem [thread:$0]  (!%p1657_p11), %s1652_s14, 128, %s1655_s16, %s239_s20  }
  0x6d   : > { %s260_s4 = scalar_lea.vmem [#allocation5], %s1646_s10  ;;  %s257_s13 = scalar_lea.sflag [#allocation6], %s256_s30 }
  0x6e   : > { %s267_s18 = sshll.u32 %s260_s4, 4  ;;  %s1349_s15 = scalar_lea.hbm %s1664_s8, 128  ;;  %s268_s18 = int_to_ptr.vmem [resolvable:$true] %s267_s18 }
  0x6f   : > { %p1350_p4 = scmp.ne.s32.totalorder %s1664_s8, %s1349_s15  ;;  %s1354_s2 = scalar_lea.hbm %s1870_s1, 256 }
  0x70   : > { %p1355_p3 = scmp.lt.u32.totalorder %s1664_s8, %s1870_s1  ;;  %p1356_p7 = scmp.lt.u32.totalorder %s1354_s2, %s1349_s15 }
  0x71   : > { %p1352_p5 = pnand %p1350_p4, %p1321_p0  ;;  %p1358_p12 = scmp.lt.u32.totalorder %s1349_s15, %s1664_s8 }
  0x72   : > { %p1357_p9 = por %p1356_p7, %p1355_p3 }
  0x73   : > { %p1353_p1 = pneg %p1352_p5 }
  0x74   : > { %p1359_p2 = por %p1358_p12, %p1357_p9 }
  0x76   : > { %p1360_p13 = pnand %p1359_p2, %p1353_p1 }
  0x78   : > { %1363 = shalt.err (!%p1360_p13)
}
  0x79   : > { %s1364_s10 = scalar_lea.vmem %s268_s18, 128  ;;  %s1464_s14 = smov [#allocation5]  }
  0x7a   : > { %p1365_p6 = scmp.ne.s32.totalorder %s268_s18, %s1364_s10  ;;  %s1369_s16 = sshll.u32 %s1464_s14, 4  ;;  %s1370_s16 = int_to_ptr.vmem [resolvable:$false] %s1369_s16 }
  0x7b   : > { %s1371_s30 = scalar_lea.vmem %s1370_s16, 256  ;;  %p1372_p5 = scmp.lt.s32.totalorder %s268_s18, %s1370_s16 }
  0x7c   : > { %p1367_p10 = pnand %p1365_p6, %p1321_p0  ;;  %p1373_p8 = scmp.lt.s32.totalorder %s1371_s30, %s1364_s10 }
  0x7e   : > { %p1368_p4 = pneg %p1367_p10  ;;  %p1374_p3 = por %p1373_p8, %p1372_p5 }
  0x80   : > { %p1375_p7 = pnand %p1374_p3, %p1368_p4 }
  0x82   : > { %1378 = shalt.err (!%p1375_p7)
}
  0x83   : > { %1184 = dma.hbm_to_vmem [thread:$0]  (!%p1657_p11), %s1664_s8, 128, %s268_s18, %s257_s13  }
  0x84   : > { %p1892_p1 = scmp.ne.s32.totalorder %s1884_s29, 0 }
  0x85   : > { %s1717_s20 = sand.u32 (!%p1892_p1), 1, %s1449_s22   ;;  %p1893_p8 = scmp.ne.s32.totalorder (!%p1892_p1), %s1882_s27, 0 }
  0x86   : > { %276 = sbr.rel (%p1892_p1) target bundleno = 1651 (0x673), region = 44  ;;  %s1720_s4 = sshll.u32 (!%p1892_p1), %s1717_s20, 3 }
  0x87   : > { %s279_s15 = scalar_lea.sflag (!%p1892_p1), [#allocation3], %s1717_s20  ;;  %s282_s17 = scalar_lea.vmem (!%p1892_p1), [#allocation2], %s1720_s4 }
  0x8d   : > { %1424 = dma.done.wait (%p1893_p8), %s279_s15, 128  }
  0x8e   : > { %1426 = vsyncadd (%p1893_p8), %s279_s15, 4294967168  ;;  %s287_s29 = sand.u32 1, %s1538_s25   ;;  %s291_s8 = scalar_lea.vmem [#allocation5], %s1720_s4 }
  0x8f   : > { %s288_s7 = scalar_lea.sflag [#allocation6], %s287_s29 }
  0x90   : > { %1428 = dma.done.wait (%p1893_p8), %s288_s7, 128  }
  0x91   : > { %1430 = vsyncadd (%p1893_p8), %s288_s7, 4294967168  ;;  %p1894_p11 = scmp.eq.s32.totalorder %s1538_s25, 0 }
  0x93   : > { %1432 = dma.done.wait (%p1894_p11), [#allocation6], 512   ;;  %p1895_p0 = pmov %p1894_p11 }
  0x95   : > { %1434 = vsyncadd (%p1895_p0), [#allocation6], 4294966784  ;;  %p1896_p9 = pmov %p1895_p0 }
  0x96   : > { %p1897_p12 = pmov %p1895_p0 }
  0x97   : > { %1436 = dma.done.wait (%p1896_p9), [#allocation9], 512  }
  0x98   : > { %1438 = vsyncadd (%p1897_p12), [#allocation9], 4294966784  ;;  %v1465_v0 = vmov 0.0   ;;  %vm1466_vm0 = vmmov 0   ;;  %v334_v1 = vld [vmem:[#allocation7] sm:$0xff]  ;;  %v335_v2 = vld [vmem:[#allocation7 + $0x8] sm:$0xff] }
  0x99   : > { %1093 = vmatprep.subr.bf16.mxu0 %v1465_v0  ;;  %1097 = vmatprep.mubr.msk.bf16.mxu0 %vm1466_vm0, %v1465_v0  ;;  %v336_v3 = vld [vmem:[#allocation7 + $0x10] sm:$0xff]  ;;  %v338_v4 = vpack.c.bf16 %v335_v2, %v334_v1  ;;  %v337_v5 = vld [vmem:[#allocation7 + $0x18] sm:$0xff]  ;;  %v341_v7 = vld [vmem:[%s282_s17] sm:$0xff]  ;;  %vm349_vm1 = vcmask 261120   ;;  %s1467_s13 = smov 96   ;;  %s1468_s12 = smov 120  }
  0x9a   : > { %1101 = vmatprep.subr.bf16.mxu1 %v1465_v0  ;;  %1103 = vmatprep.mubr.msk.bf16.mxu1 %vm1466_vm0, %v1465_v0  ;;  %v339_v6 = vpack.c.bf16 %v337_v5, %v336_v3  ;;  %v342_v8 = vpack.c.bf16 %v341_v7, %v341_v7  ;;  %v1055_v9 = vld [vmem:[%s1872_s3] ss:$0 sm:$0xff]  ;;  %s1469_s2 = smov 88   ;;  %s1470_s19 = smov 80   ;;  %vm400_vm2 = vcmask 64512   ;;  %v394_v29 = vld [vmem:[%s291_s8] sm:$0xff] }
  0x9b   : > { %1094 = vmatpush3.bf16.msra.mxu0 %v338_v4  ;;  %s1471_s11 = smov 112   ;;  %s1472_s10 = smov 72   ;;  %vm464_vm3 = vcmask 1043456   ;;  %vm852_vm4 = vcmask 130048   ;;  %vm854_vm5 = vcmask 195584  }
  0x9c   : > { %1095 = vmatprep.subr.bf16.mxu0 %v1465_v0  ;;  %s1473_s14 = smov 104   ;;  %s1474_s16 = smov 56  }
  0x9d   : > { %s1475_s30 = smov 64   ;;  %s1476_s15 = smov 40  }
  0x9e   : > { %s1477_s17 = smov 48   ;;  %s1478_s29 = smov 8  }
  0x9f   : > { %1096 = vmatpush3.bf16.msra.mxu0 %v339_v6  ;;  %s1479_s7 = smov 16   ;;  %s1480_s8 = smov 24  }
  0xa0   : > { %1107 = vmatprep.subr.bf16.mxu0 %v1465_v0  ;;  %p1898_p13 = scmp.ne.s32.totalorder %s1889_s9, 0 }
  0xa2   : > { %1098 = vmatmul.mubr.msk.bf16.vlgmr.msra.gmra.mrb[0].mxu0 %vm349_vm1, %v342_v8 }
  0xa3   : > { %1109 = vmatprep.mubr.msk.bf16.mxu0 %vm1466_vm0, %v1465_v0 }
 0x175   : > { %v387_v10 = vpop.f32.mrb[0].mxu0 }
 0x176   : > { %v388_v11 = vadd.f32 %v1055_v9, %v387_v10  ;;  %v1099_v12 = vpop.f32.mrb[1].mxu0 }
 0x177   : > { %v390_v13 = vpop.f32.mrb[2].mxu0 }
 0x178   : > { %v393_v14 = vmul.f32 0.35355338, %v388_v11  ;;  %v1756_v15 = vpack.c.bf16 %v388_v11, %v388_v11  ;;  %v1100_v16 = vpop.f32.mrb[3].mxu0 }
 0x17a   : > { %v395_v17 = vpack.c.bf16 %v393_v14, %v393_v14  ;;  %398 = vrot.lane.b32.xlu0 %v1756_v15, %s1467_s13  ;;  %s1068_s13 = sshll.u32 %s1538_s25, 7  ;;  %s915_s25 = scalar_lea.sflag [#allocation4], %s1717_s20 }
 0x17c   : > { %509 = vrot.lane.b32.xlu1 %v395_v17, %s1468_s12  ;;  %s332_s12 = scalar_lea.vmem [#allocation10], %s1720_s4 }
 0x17e   : > { %511 = vrot.lane.b32.xlu0 %v1756_v15, %s1469_s2  ;;  %s928_s2 = sshll.u32 %s332_s12, 4  ;;  %s1826_s2 = int_to_ptr.vmem [resolvable:$true] %s928_s2 }
 0x17f   : > { %s1379_s4 = scalar_lea.vmem %s1826_s2, 128 }
 0x180   : > { %621 = vrot.lane.b32.xlu1 %v1756_v15, %s1470_s19  ;;  %p1380_p2 = scmp.ne.s32.totalorder %s1826_s2, %s1379_s4 }
 0x182   : > { %619 = vrot.lane.b32.xlu0 %v395_v17, %s1471_s11  ;;  %p1381_p6 = pnand %p1380_p2, %p1898_p13 }
 0x184   : > { %731 = vrot.lane.b32.xlu1 %v1756_v15, %s1472_s10  ;;  %s1824_s10 = scalar_lea.hbm %s1875_s6, %s1068_s13  ;;  %p1382_p10 = pneg %p1381_p6 }
 0x186   : > { %729 = vrot.lane.b32.xlu0 %v395_v17, %s1473_s14  ;;  %s1481_s14 = smov [#allocation10]  }
 0x1ec   : > { %v399_v18 = vpop.permute.xlu0 %398 }
 0x1ed   : > { %v405_v19 = vsel %vm400_vm2, %v399_v18, 0 }
 0x1ee   : > { %1102 = vmatpush3.bf16.xpose.msra.mxu1 %v405_v19  ;;  %v510_v21 = vpop.permute.xlu1 %509 }
 0x1ef   : > { %1113 = vmatprep.subr.bf16.mxu1 %v1465_v0 }
 0x1f0   : > { %v512_v20 = vpop.permute.xlu0 %511 }
 0x1f1   : > { %v517_v22 = vsel %vm400_vm2, %v512_v20, 0 }
 0x1f2   : > { %v622_v23 = vpop.permute.xlu1 %621 }
 0x1f3   : > { %v627_v24 = vsel %vm400_vm2, %v622_v23, 0 }
 0x1f4   : > { %v620_v26 = vpop.permute.xlu0 %619 }
 0x1f5   : > { %1104 = vmatmul.mubr.msk.bf16.vlgmr.msra.gmra.mrb[0].mxu1 %vm400_vm2, %v395_v17 }
 0x1f6   : > { %1114 = vmatpush3.bf16.xpose.msra.mxu1 %v517_v22  ;;  %1115 = vmatprep.mubr.msk.bf16.mxu1 %vm1466_vm0, %v1465_v0  ;;  %v732_v25 = vpop.permute.xlu1 %731 }
 0x1f7   : > { %1125 = vmatprep.subr.bf16.mxu1 %v1465_v0  ;;  %v737_v27 = vsel %vm400_vm2, %v732_v25, 0 }
 0x1f8   : > { %v730_v28 = vpop.permute.xlu0 %729 }
 0x1fd   : > { %1116 = vmatmul.mubr.msk.bf16.vlgmr.msra.gmra.mrb[4].mxu1 %vm400_vm2, %v510_v21 }
 0x1fe   : > { %1126 = vmatpush3.bf16.xpose.msra.mxu1 %v627_v24  ;;  %1127 = vmatprep.mubr.msk.bf16.mxu1 %vm1466_vm0, %v1465_v0 }
 0x1ff   : > { %1137 = vmatprep.subr.bf16.mxu1 %v1465_v0 }
 0x205   : > { %1128 = vmatmul.mubr.msk.bf16.vlgmr.msra.gmra.mrb[8].mxu1 %vm400_vm2, %v620_v26 }
 0x206   : > { %1138 = vmatpush3.bf16.xpose.msra.mxu1 %v737_v27  ;;  %1139 = vmatprep.mubr.msk.bf16.mxu1 %vm1466_vm0, %v1465_v0 }
 0x207   : > { %1149 = vmatprep.subr.bf16.mxu1 %v1465_v0 }
 0x20d   : > { %1140 = vmatmul.mubr.msk.bf16.vlgmr.msra.gmra.mrb[12].mxu1 %vm400_vm2, %v730_v28 }
 0x20e   : > { %1153 = vmatprep.mubr.msk.bf16.mxu1 %vm1466_vm0, %v1465_v0 }
 0x2c8   : > { %v441_v30 = vpop.f32.mrb[0].mxu1 }
 0x2c9   : > { %v442_v31 = vadd.f32 %v441_v30, %v394_v29  ;;  %v1105_v32 = vpop.f32.mrb[1].mxu1 }
 0x2ca   : > { %v444_v33 = vpop.f32.mrb[2].mxu1 }
 0x2cb   : > { %v1106_v34 = vpop.f32.mrb[3].mxu1  ;;  %v447_v35 = vsel %vm400_vm2, %v442_v31, -inf }
 0x2cc   : > { %448 = vmax.xlane.f32.xlu1 %v447_v35 }
 0x2d0   : > { %v553_v36 = vpop.f32.mrb[4].mxu1 }
 0x2d1   : > { %v554_v37 = vadd.f32 %v553_v36, %v394_v29  ;;  %v1117_v38 = vpop.f32.mrb[5].mxu1 }
 0x2d2   : > { %v556_v39 = vpop.f32.mrb[6].mxu1 }
 0x2d3   : > { %v1118_v40 = vpop.f32.mrb[7].mxu1  ;;  %v559_v41 = vsel %vm400_vm2, %v554_v37, -inf }
 0x2d4   : > { %560 = vmax.xlane.f32.xlu0 %v559_v41 }
 0x2d8   : > { %v663_v42 = vpop.f32.mrb[8].mxu1 }
 0x2d9   : > { %v664_v43 = vadd.f32 %v663_v42, %v394_v29  ;;  %v1129_v44 = vpop.f32.mrb[9].mxu1 }
 0x2da   : > { %v666_v45 = vpop.f32.mrb[10].mxu1  ;;  %v858_v44 = vld [vmem:[#allocation8 + $0x8] sm:$0xff] }
 0x2db   : > { %v1130_v46 = vpop.f32.mrb[11].mxu1  ;;  %v669_v47 = vsel %vm400_vm2, %v664_v43, -inf }
 0x2dc   : > { %670 = vmax.xlane.f32.xlu0 %v669_v47  ;;  %v859_v46 = vld [vmem:[#allocation8 + $0x10] sm:$0xff]  ;;  %v860_v47 = vld [vmem:[#allocation8 + $0x18] sm:$0xff] }
 0x2e0   : > { %v773_v48 = vpop.f32.mrb[12].mxu1 }
 0x2e1   : > { %v774_v49 = vadd.f32 %v773_v48, %v394_v29  ;;  %v1141_v50 = vpop.f32.mrb[13].mxu1  ;;  %v862_v48 = vpack.c.bf16 %v860_v47, %v859_v46 }
 0x2e2   : > { %v776_v51 = vpop.f32.mrb[14].mxu1 }
 0x2e3   : > { %v1142_v52 = vpop.f32.mrb[15].mxu1  ;;  %v779_v53 = vsel %vm400_vm2, %v774_v49, -inf }
 0x2e4   : > { %780 = vmax.xlane.f32.xlu1 %v779_v53 }
 0x359   : > { %v449_v54 = vpop.xlane.xlu1 %448 }
 0x35a   : > { %v450_v55 = vsub.f32 %v442_v31, %v449_v54 }
 0x35c   : > { %v451_v56 = vmul.f32 1.442695, %v450_v55 }
 0x35e   : > { %1247 = vpow2.f32 %v451_v56 }
 0x361   : > { %v561_v57 = vpop.xlane.xlu0 %560 }
 0x362   : > { %v562_v58 = vsub.f32 %v554_v37, %v561_v57 }
 0x364   : > { %v563_v59 = vmul.f32 1.442695, %v562_v58 }
 0x366   : > { %1249 = vpow2.f32 %v563_v59 }
 0x368   : > { %v1248_v60 = vpop.eup %1247 }
 0x369   : > { %v671_v61 = vpop.xlane.xlu0 %670  ;;  %v453_v62 = vsel %vm400_vm2, %v1248_v60, 0.0 }
 0x36a   : > { %v672_v63 = vsub.f32 %v664_v43, %v671_v61  ;;  %454 = vadd.xlane.f32.xlu0 %v453_v62  ;;  %v857_v43 = vld [vmem:[#allocation8] sm:$0xff] }
 0x36b   : > { %v861_v45 = vpack.c.bf16 %v858_v44, %v857_v43 }
 0x36c   : > { %v673_v1 = vmul.f32 1.442695, %v672_v63  ;;  %v1065_v63 = vld [vmem:[%s1874_s5] ss:$0 sm:$0xff] }
 0x36d   : > { %1150 = vmatpush3.bf16.msra.mxu1 %v861_v45 }
 0x36e   : > { %1251 = vpow2.f32 %v673_v1  ;;  %1151 = vmatprep.subr.bf16.mxu1 %v1465_v0 }
 0x370   : > { %v1250_v2 = vpop.eup %1249 }
 0x371   : > { %v565_v3 = vsel %vm400_vm2, %v1250_v2, 0.0  ;;  %v781_v6 = vpop.xlane.xlu1 %780  ;;  %1152 = vmatpush3.bf16.msra.mxu1 %v862_v48 }
 0x372   : > { %566 = vadd.xlane.f32.xlu1 %v565_v3  ;;  %v782_v7 = vsub.f32 %v774_v49, %v781_v6 }
 0x374   : > { %v783_v8 = vmul.f32 1.442695, %v782_v7 }
 0x376   : > { %1253 = vpow2.f32 %v783_v8 }
 0x378   : > { %v1252_v4 = vpop.eup %1251 }
 0x379   : > { %v675_v5 = vsel %vm400_vm2, %v1252_v4, 0.0 }
 0x37a   : > { %676 = vadd.xlane.f32.xlu0 %v675_v5 }
 0x380   : > { %v1254_v9 = vpop.eup %1253 }
 0x381   : > { %v785_v10 = vsel %vm400_vm2, %v1254_v9, 0.0 }
 0x383   : > { %571 = vrot.lane.b32.xlu1 %v1756_v15, %s1474_s16  ;;  %s1383_s16 = sshll.u32 %s1481_s14, 4  ;;  %s1384_s16 = int_to_ptr.vmem [resolvable:$false] %s1383_s16 }
 0x384   : > { %p1386_p4 = scmp.lt.s32.totalorder %s1826_s2, %s1384_s16 }
 0x390   : > { %459 = vrot.lane.b32.xlu0 %v1756_v15, %s1475_s30  ;;  %s1385_s30 = scalar_lea.vmem %s1384_s16, 256 }
 0x391   : > { %p1387_p5 = scmp.lt.s32.totalorder %s1385_s30, %s1379_s4 }
 0x393   : > { %p1388_p3 = por %p1387_p5, %p1386_p4 }
 0x394   : > { %791 = vrot.lane.b32.xlu0 %v1756_v15, %s1476_s15 }
 0x395   : > { %p1389_p7 = pnand %p1388_p3, %p1382_p10 }
 0x3a7   : > { %786 = vadd.xlane.f32.xlu1 %v785_v10 }
 0x3b8   : > { %681 = vrot.lane.b32.xlu1 %v1756_v15, %s1477_s17 }
 0x3f7   : > { %v455_v11 = vpop.xlane.xlu0 %454 }
 0x3f8   : > { %1255 = vrcp.f32 %v455_v11 }
 0x3ff   : > { %v567_v12 = vpop.xlane.xlu1 %566 }
 0x400   : > { %1257 = vrcp.f32 %v567_v12 }
 0x402   : > { %v1256_v13 = vpop.eup %1255 }
 0x403   : > { %v457_v16 = vmul.f32 %v1256_v13, %v1248_v60  ;;  %v572_v19 = vpop.permute.xlu1 %571 }
 0x404   : > { %v577_v22 = vsel %vm464_vm3, %v572_v19, 0 }
 0x405   : > { %v458_v20 = vpack.c.bf16 %v457_v16, %v457_v16 }
 0x407   : > { %v677_v14 = vpop.xlane.xlu0 %676 }
 0x408   : > { %1259 = vrcp.f32 %v677_v14 }
 0x40a   : > { %v1258_v21 = vpop.eup %1257 }
 0x40b   : > { %v460_v17 = vpop.permute.xlu0 %459  ;;  %v569_v15 = vmul.f32 %v1258_v21, %v1250_v2 }
 0x40c   : > { %v466_v18 = vsel %vm464_vm3, %v460_v17, 0 }
 0x40d   : > { %1108 = vmatpush3.bf16.msra.mxu0 %v466_v18  ;;  %v570_v23 = vpack.c.bf16 %v569_v15, %v569_v15 }
 0x40e   : > { %1119 = vmatprep.subr.bf16.mxu0 %v1465_v0 }
 0x40f   : > { %v792_v29 = vpop.permute.xlu0 %791 }
 0x410   : > { %1110 = vmatmul.mubr.msk.bf16.vlgmr.msra.gmra.mrb[4].mxu0 %vm400_vm2, %v458_v20  ;;  %v797_v31 = vsel %vm464_vm3, %v792_v29, 0 }
 0x411   : > { %1120 = vmatpush3.bf16.msra.mxu0 %v577_v22  ;;  %1121 = vmatprep.mubr.msk.bf16.mxu0 %vm1466_vm0, %v1465_v0 }
 0x412   : > { %1131 = vmatprep.subr.bf16.mxu0 %v1465_v0  ;;  %v1260_v24 = vpop.eup %1259 }
 0x413   : > { %v679_v26 = vmul.f32 %v1260_v24, %v1252_v4 }
 0x415   : > { %v680_v30 = vpack.c.bf16 %v679_v26, %v679_v26 }
 0x418   : > { %1122 = vmatmul.mubr.msk.bf16.vlgmr.msra.gmra.mrb[8].mxu0 %vm400_vm2, %v570_v23 }
 0x419   : > { %1133 = vmatprep.mubr.msk.bf16.mxu0 %vm1466_vm0, %v1465_v0 }
 0x434   : > { %v787_v25 = vpop.xlane.xlu1 %786 }
 0x435   : > { %1261 = vrcp.f32 %v787_v25 }
 0x438   : > { %v682_v27 = vpop.permute.xlu1 %681 }
 0x439   : > { %v687_v28 = vsel %vm464_vm3, %v682_v27, 0 }
 0x43a   : > { %1132 = vmatpush3.bf16.msra.mxu0 %v687_v28 }
 0x43b   : > { %1143 = vmatprep.subr.bf16.mxu0 %v1465_v0 }
 0x43d   : > { %1134 = vmatmul.mubr.msk.bf16.vlgmr.msra.gmra.mrb[12].mxu0 %vm400_vm2, %v680_v30 }
 0x43e   : > { %1144 = vmatpush3.bf16.msra.mxu0 %v797_v31  ;;  %1145 = vmatprep.mubr.msk.bf16.mxu0 %vm1466_vm0, %v1465_v0 }
 0x43f   : > { %v1262_v32 = vpop.eup %1261 }
 0x440   : > { %v789_v33 = vmul.f32 %v1262_v32, %v1254_v9 }
 0x442   : > { %v790_v34 = vpack.c.bf16 %v789_v33, %v789_v33 }
 0x445   : > { %1146 = vmatmul.mubr.msk.bf16.vlgmr.msra.gmra.mrb[16].mxu0 %vm400_vm2, %v790_v34 }
 0x4e3   : > { %v502_v35 = vpop.f32.mrb[4].mxu0 }
 0x4e4   : > { %v1111_v36 = vpop.f32.mrb[5].mxu0 }
 0x4e5   : > { %v505_v37 = vpop.f32.mrb[6].mxu0 }
 0x4e6   : > { %v1112_v38 = vpop.f32.mrb[7].mxu0 }
 0x4eb   : > { %v613_v39 = vpop.f32.mrb[8].mxu0 }
 0x4ec   : > { %840 = vrot.lane.b32.xlu1 %v613_v39, %s1478_s29  ;;  %v1123_v40 = vpop.f32.mrb[9].mxu0 }
 0x4ed   : > { %v616_v41 = vpop.f32.mrb[10].mxu0 }
 0x4ee   : > { %v1124_v42 = vpop.f32.mrb[11].mxu0 }
 0x510   : > { %v723_v49 = vpop.f32.mrb[12].mxu0 }
 0x511   : > { %844 = vrot.lane.b32.xlu0 %v723_v49, %s1479_s7  ;;  %v1135_v50 = vpop.f32.mrb[13].mxu0 }
 0x512   : > { %v726_v51 = vpop.f32.mrb[14].mxu0 }
 0x513   : > { %v1136_v52 = vpop.f32.mrb[15].mxu0 }
 0x518   : > { %v833_v53 = vpop.f32.mrb[16].mxu0 }
 0x519   : > { %848 = vrot.lane.b32.xlu1 %v833_v53, %s1480_s8  ;;  %v1147_v54 = vpop.f32.mrb[17].mxu0 }
 0x51a   : > { %v836_v55 = vpop.f32.mrb[18].mxu0 }
 0x51b   : > { %v1148_v56 = vpop.f32.mrb[19].mxu0 }
 0x55e   : > { %v841_v57 = vpop.permute.xlu1 %840 }
 0x55f   : > { %v851_v58 = vsel %vm400_vm2, %v502_v35, %v841_v57 }
 0x583   : > { %v845_v0 = vpop.permute.xlu0 %844 }
 0x584   : > { %v853_v59 = vsel %vm852_vm4, %v851_v58, %v845_v0 }
 0x58b   : > { %v849_v60 = vpop.permute.xlu1 %848 }
 0x58c   : > { %v855_v61 = vsel %vm854_vm5, %v853_v59, %v849_v60 }
 0x58d   : > { %v856_v62 = vpack.c.bf16 %v855_v61, %v855_v61 }
 0x58f   : > { %1154 = vmatmul.mubr.msk.bf16.vlgmr.msra.gmra.mrb[16].mxu1 %vm349_vm1, %v856_v62 }
 0x662   : > { %v907_v1 = vpop.f32.mrb[16].mxu1 }
 0x663   : > { %v908_v2 = vadd.f32 %v1065_v63, %v907_v1  ;;  %v1155_v3 = vpop.f32.mrb[17].mxu1 }
 0x664   : > { %v910_v4 = vpop.f32.mrb[18].mxu1 }
 0x665   : > { %v1156_v5 = vpop.f32.mrb[19].mxu1  ;;  %913 = vst.msk [vmem:[%s332_s12] sm:$0xff] %vm349_vm1, %v908_v2 }
 0x666   : > { %1392 = shalt.err (!%p1389_p7)
}
 0x667   : > { %s1393_s20 = scalar_lea.hbm %s1824_s10, 128  ;;  %s1397_s29 = scalar_lea.hbm %s1875_s6, 256 }
 0x668   : > { %p1394_p1 = scmp.ne.s32.totalorder %s1824_s10, %s1393_s20  ;;  %p1398_p0 = scmp.lt.u32.totalorder %s1824_s10, %s1875_s6 }
 0x669   : > { %p1399_p9 = scmp.lt.u32.totalorder %s1397_s29, %s1393_s20  ;;  %p1401_p2 = scmp.lt.u32.totalorder %s1393_s20, %s1824_s10 }
 0x66a   : > { %p1395_p8 = pnand %p1394_p1, %p1898_p13 }
 0x66b   : > { %p1400_p12 = por %p1399_p9, %p1398_p0 }
 0x66c   : > { %p1396_p11 = pneg %p1395_p8 }
 0x66d   : > { %p1402_p6 = por %p1401_p2, %p1400_p12 }
 0x66f   : > { %p1403_p10 = pnand %p1402_p6, %p1396_p11 }
 0x671   : > { %1406 = shalt.err (!%p1403_p10)
}
 0x672   : > { %1169 = dma.vmem_to_hbm [thread:$0]  (%p1898_p13), %s1826_s2, 128, %s1824_s10, %s915_s25  }
 0x673 PF: > { %s940_s27 = sand.u32 1, %s1445_s21   ;;  %p1899_p4 = scmp.ne.s32.totalorder %s1883_s28, 0 }
 0x674   : > { %p1900_p5 = scmp.ge.s32.totalorder %s1457_s24, 2  ;;  %s941_s18 = scalar_lea.sflag [#allocation4], %s940_s27 }
 0x676   : > { %p1186_p3 = pnand %p1900_p5, %p1899_p4 }
 0x678   : > { %1440 = dma.done.wait (!%p1186_p3), %s941_s18, 128  }
 0x679   : > { %1442 = vsyncadd (!%p1186_p3), %s941_s18, 4294967168  ;;  %s1901_s13 = sld [smem:[#allocation16_spill]]  ;;  %p23_p7 = scmp.ge.s32.totalorder %s1627_s26, 4  }
 0x67a   : > { %s1902_s21 = smov %s1449_s22  ;;  %s1903_s22 = smov %s1453_s23 }
 0x67b   : > { %s1905_s24 = smov %s1627_s26  ;;  %25 = sbr.rel (!%p23_p7) target bundleno = 11 (0xb), region = 110 }
 0x67f   : > { %s1904_s23 = smov %s1901_s13 }
 0x682   :  { %946 = vsyncpa [#allocation3], 1 }
 0x683   :  { %948 = vsyncpa [#allocation3 + $0x1], 1 }
 0x684   :  { %949 = vsyncpa [#allocation6], 1 }
 0x685   :  { %951 = vsyncpa [#allocation6 + $0x1], 1 }
 0x686   :  { %952 = vsyncpa [#allocation9], 1 }
 0x687   :  { %953 = vsyncpa [#allocation4], 1 }
 0x688   :  { %955 = vsyncpa [#allocation4 + $0x1], 1 }

</bundles_post_ra>
